<compile_context>
chip_gen: v7x
topology: tpu7x:2x2x1
jax: 0.10.0
libtpu: 0.0.40
codegen_flags: <defaults>
</compile_context>

<pallas_src>
import functools

import jax
import jax.numpy as jnp
from jax.experimental import pallas as pl
from jax.experimental.pallas import tpu as pltpu

_LANE = 128
_MIB = 1024 * 1024


def _round_up(x: int, m: int) -> int:
    return ((x + m - 1) // m) * m


def _gcl_rowpass_kernel(a_ref, xw_ref, o_ref, *, ifrelu: bool):
    """Single streaming pass: out_i = relu(A_i @ XW); XW fully VMEM-resident."""
    out = jnp.dot(a_ref[...], xw_ref[...], preferred_element_type=jnp.float32)
    if ifrelu:
        out = jnp.maximum(out, 0.0)
    o_ref[...] = out.astype(o_ref.dtype)


def _gcl_kacc_kernel(a_ref, xw_ref, o_ref, acc_ref, *, ifrelu: bool):
    """Fallback for very large N: k-tiled reduction with an f32 accumulator."""
    k = pl.program_id(1)

    @pl.when(k == 0)
    def _():
        acc_ref[...] = jnp.zeros_like(acc_ref)

    acc_ref[...] += jnp.dot(a_ref[...], xw_ref[...],
                            preferred_element_type=jnp.float32)

    @pl.when(k == pl.num_programs(1) - 1)
    def _():
        out = acc_ref[...]
        if ifrelu:
            out = jnp.maximum(out, 0.0)
        o_ref[...] = out.astype(o_ref.dtype)


def _vmem_budget_bytes() -> int:
    """~3/4 of physical VMEM: ~96 MiB on v5e/v6e (128 MiB), ~48 MiB on v7x (64 MiB)."""
    try:
        info = pltpu.get_tpu_info()
        phys = int(getattr(info, "vmem_capacity_bytes", 64 * _MIB))
    except Exception:
        phys = 64 * _MIB  # conservative (v7x per-TC) fallback
    return min((phys * 3) // 4, 96 * _MIB)


def gcl_forward(A, X, W, ifrelu=True, *, compute_dtype=None):
    """Pallas implementation of GCL.forward((A, X)) -> (A, out).

    compute_dtype: optionally cast A/X/W at the kernel boundary (jnp.bfloat16 is
    the recommended choice on v6e/v7x: halves the A HBM stream and uses the bf16
    MXU; accumulation stays f32, XW is rounded once -> use relaxed tolerances).
    Default keeps the input dtype so f32 reference tolerances hold.
    """
    A_in = A  # adjacency is passed through untouched, like the torch module
    N, N2 = A.shape
    assert N == N2, "A must be square (N, N)"
    Nx, P = X.shape
    assert Nx == N
    Pw, H = W.shape
    assert Pw == P

    out_dtype = X.dtype
    if compute_dtype is not None:
        A = A.astype(compute_dtype)
        X = X.astype(compute_dtype)
        W = W.astype(compute_dtype)
    cdtype = A.dtype
    itemsize = jnp.dtype(cdtype).itemsize
    out_itemsize = jnp.dtype(out_dtype).itemsize

    Np = _round_up(N, _LANE)   # 128-aligned node count
    Pp = _round_up(P, _LANE)   # lane-dense contraction dim for X@W
    Hp = _round_up(H, _LANE)   # lane-dense output dim (unmasked stores)

    budget = _vmem_budget_bytes()

    # ---- hoisted X@W: computed once, outside the A-streaming grid -------------
    X_p = jnp.pad(X, ((0, Np - N), (0, Pp - P)))
    W_p = jnp.pad(W, ((0, Pp - P), (0, Hp - H)))
    XW = jnp.dot(X_p, W_p, preferred_element_type=jnp.float32).astype(cdtype)

    # Row-tile cap: multiple of 128, and <= Np//2 when possible so the "parallel"
    # row axis has >= 2 steps (keeps both v7x TensorCores busy).
    if Np <= _LANE:
        row_cap = Np
    else:
        row_cap = max(_LANE, ((Np // 2) // _LANE) * _LANE)

    kernel_common = dict(ifrelu=bool(ifrelu))

    # ---- strategy 1: single pass over A, XW fully VMEM-resident ---------------
    xw_res_bytes = Np * Hp * itemsize
    tm_single = None
    for cand in (1024, 512, 256, 128):
        if cand > row_cap:
            continue
        footprint = (2 * cand * Np * itemsize        # double-buffered A row stripe
                     + xw_res_bytes                  # resident XW
                     + 2 * cand * Hp * out_itemsize)  # double-buffered output
        if footprint <= budget:
            tm_single = cand
            break

    if tm_single is not None:
        tm = tm_single
        Nr = _round_up(N, tm)
        # zero pad (elided by XLA when pad amounts are 0, i.e. aligned N)
        A_p = jnp.pad(A, ((0, Nr - N), (0, Np - N)))

        cost = pl.CostEstimate(
            flops=2 * Nr * Np * Hp,
            transcendentals=0,
            bytes_accessed=(A_p.size + XW.size) * itemsize
            + Nr * Hp * out_itemsize,
        )

        out_padded = pl.pallas_call(
            functools.partial(_gcl_rowpass_kernel, **kernel_common),
            out_shape=jax.ShapeDtypeStruct((Nr, Hp), out_dtype),
            grid_spec=pltpu.PrefetchScalarGridSpec(
                num_scalar_prefetch=0,
                grid=(Nr // tm,),
                in_specs=[
                    pl.BlockSpec((tm, Np), lambda i: (i, 0)),   # A row stripe
                    pl.BlockSpec((Np, Hp), lambda i: (0, 0)),   # XW resident
                ],
                out_specs=pl.BlockSpec((tm, Hp), lambda i: (i, 0)),
            ),
            compiler_params=pltpu.CompilerParams(
                dimension_semantics=("parallel",),
                vmem_limit_bytes=budget,
            ),
            cost_estimate=cost,
        )(A_p, XW)

        out = out_padded[:N, :H]
        return A_in, out

    # ---- strategy 2 (very large N): 2-D grid with f32 accumulator -------------
    tm = tk = None
    for tm_c in (512, 256, 128):
        if tm_c > row_cap:
            continue
        for tk_c in (4096, 2048, 1024, 512, 256, 128):
            if tk_c > Np:
                continue
            footprint = (2 * tm_c * tk_c * itemsize     # A tile (double-buffered)
                         + 2 * tk_c * Hp * itemsize     # XW tile (double-buffered)
                         + tm_c * Hp * 4                # f32 accumulator
                         + 2 * tm_c * Hp * out_itemsize)
            if footprint <= budget:
                tm, tk = tm_c, tk_c
                break
        if tm is not None:
            break
    if tm is None:
        tm, tk = 128, 128  # minimal, always fits

    Nr = _round_up(N, tm)
    Nk = _round_up(N, tk)
    A_p = jnp.pad(A, ((0, Nr - N), (0, Nk - N)))
    XW_p = jnp.pad(XW, ((0, Nk - Np), (0, 0)))

    cost = pl.CostEstimate(
        flops=2 * Nr * Nk * Hp,
        transcendentals=0,
        bytes_accessed=A_p.size * itemsize
        + (Nr // tm) * XW_p.size * itemsize   # XW re-streamed once per row pass
        + Nr * Hp * out_itemsize,
    )

    out_padded = pl.pallas_call(
        functools.partial(_gcl_kacc_kernel, **kernel_common),
        out_shape=jax.ShapeDtypeStruct((Nr, Hp), out_dtype),
        grid_spec=pltpu.PrefetchScalarGridSpec(
            num_scalar_prefetch=0,
            grid=(Nr // tm, Nk // tk),
            in_specs=[
                pl.BlockSpec((tm, tk), lambda i, k: (i, k)),   # A tile
                pl.BlockSpec((tk, Hp), lambda i, k: (k, 0)),   # XW tile
            ],
            out_specs=pl.BlockSpec((tm, Hp), lambda i, k: (i, 0)),
            scratch_shapes=[pltpu.VMEM((tm, Hp), jnp.float32)],
        ),
        compiler_params=pltpu.CompilerParams(
            dimension_semantics=("parallel", "arbitrary"),
            vmem_limit_bytes=budget,
        ),
        cost_estimate=cost,
    )(A_p, XW_p)

    out = out_padded[:N, :H]
    return A_in, out


if __name__ == "__main__":
    # Small, module-consistent shapes: N nodes, p_h_dims input feats, h_dims out feats.
    N, p_h_dims, h_dims = 16, 32, 32

    key = jax.random.PRNGKey(0)
    k_a, k_x, k_w = jax.random.split(key, 3)

    A = jax.random.normal(k_a, (N, N), dtype=jnp.float32)
    X = jax.random.normal(k_x, (N, p_h_dims), dtype=jnp.float32)
    # Deterministic init of the nn.Parameter (torch.randn((p_h_dims, h_dims)))
    W = jax.random.normal(k_w, (p_h_dims, h_dims), dtype=jnp.float32)

    A_out, out = gcl_forward(A, X, W, ifrelu=True)
    jax.block_until_ready(out)

    # Reference check in plain JAX (same semantics as the torch module).
    ref = jnp.maximum(A @ X @ W, 0.0)
    assert out.shape == ref.shape
    assert jnp.allclose(out, ref, atol=1e-4, rtol=1e-4), "mismatch vs reference"
    assert A_out is A  # adjacency passed through untouched, like the torch module

    # No-relu path.
    _, out_nr = gcl_forward(A, X, W, ifrelu=False)
    jax.block_until_ready(out_nr)
    assert jnp.allclose(out_nr, A @ X @ W, atol=1e-4, rtol=1e-4)

    # bf16 compute path (recommended on v6e/v7x; relaxed tolerance due to
    # bf16 operands + one rounding of the hoisted XW, f32 accumulation).
    _, out_bf = gcl_forward(A, X, W, ifrelu=True, compute_dtype=jnp.bfloat16)
    jax.block_until_ready(out_bf)
    assert jnp.allclose(out_bf.astype(jnp.float32), ref, atol=1.0, rtol=5e-2)

    print("KERNEL_OK")
</pallas_src>

<mosaic_0001>
module attributes {stable_mosaic.version = 11 : i64} {
  func.func @_gcl_rowpass_kernel(%arg0: i32, %arg1: memref<128x128xf32, #tpu.memory_space<vmem>>, %arg2: memref<128x128xf32, #tpu.memory_space<vmem>>, %arg3: memref<128x128xf32, #tpu.memory_space<vmem>>) attributes {dimension_semantics = [#tpu.dimension_semantics<parallel>], iteration_bounds = array<i64: 1>, scalar_prefetch = 0 : i64, scratch_operands = 0 : i64, tpu.core_type = #tpu.core_type<tc>, window_params = [{transform_indices = @transform_0, window_bounds = array<i64: 128, 128>}, {pipeline_mode = #tpu.pipeline_mode<synchronous>, transform_indices = @transform_1, window_bounds = array<i64: 128, 128>}, {transform_indices = @transform_2, window_bounds = array<i64: 128, 128>}]} {
    %c0 = arith.constant 0 : index
    %c0_0 = arith.constant 0 : index
    %0 = vector.load %arg1[%c0, %c0_0] : memref<128x128xf32, #tpu.memory_space<vmem>>, vector<128x128xf32>
    %c0_1 = arith.constant 0 : index
    %c0_2 = arith.constant 0 : index
    %1 = vector.load %arg2[%c0_1, %c0_2] : memref<128x128xf32, #tpu.memory_space<vmem>>, vector<128x128xf32>
    %cst = arith.constant dense<0.000000e+00> : vector<128x128xf32>
    %2 = tpu.matmul %0, %1, %cst {dimension_numbers = #tpu.dot_dimension_numbers<[1], [0], [0], [1], [0, 0, 1, 1], [], []>} : vector<128x128xf32>, vector<128x128xf32>, vector<128x128xf32> -> vector<128x128xf32>
    %cst_3 = arith.constant 0.000000e+00 : f32
    %3 = vector.broadcast %cst_3 : f32 to vector<128x128xf32>
    %4 = arith.maximumf %2, %3 : vector<128x128xf32>
    %c0_4 = arith.constant 0 : index
    %c0_5 = arith.constant 0 : index
    %5 = vector.load %arg3[%c0_4, %c0_5] : memref<128x128xf32, #tpu.memory_space<vmem>>, vector<128x128xf32>
    tpu.vector_store %arg3[%c0_4, %c0_5], %4 {strides = array<i32>} : memref<128x128xf32, #tpu.memory_space<vmem>>, vector<128x128xf32>,
    return
  }
  func.func @transform_0(%arg0: i32) -> (i32, i32) {
    %c0_i32 = arith.constant 0 : i32
    %c0_i32_0 = arith.constant 0 : i32
    return %arg0, %c0_i32 : i32, i32
  }
  func.func @transform_1(%arg0: i32) -> (i32, i32) {
    %c0_i32 = arith.constant 0 : i32
    %c0_i32_0 = arith.constant 0 : i32
    %c0_i32_1 = arith.constant 0 : i32
    return %c0_i32, %c0_i32_0 : i32, i32
  }
  func.func @transform_2(%arg0: i32) -> (i32, i32) {
    %c0_i32 = arith.constant 0 : i32
    %c0_i32_0 = arith.constant 0 : i32
    return %arg0, %c0_i32 : i32, i32
  }
}

</mosaic_0001>

<bundles_post_ra>
// kernel: tpu_custom_call.1
= control target key start
LH: loop header
LB: loop body
LE: loop exit
PB: predicated region body
PF: predicated region fallthrough
CT: control target
= control target key end

     0   :  { %7 = vsyncpa [#allocation3], 0  ;;  %s545_s0 = inlined_call_operand.hbm [shape: f32[128,128], index: 0, kind: input, shape index: {}]   ;;  %s546_s1 = inlined_call_operand.hbm [shape: f32[128,128], index: 1, kind: input, shape index: {}]   ;;  %s547_s2 = inlined_call_operand.hbm [shape: f32[128,128], index: 2, kind: output, shape index: {}]  }
   0x1   :  { %8 = vsyncpa [#allocation6], 0 }
   0x2   :  { %9 = vsyncpa [#allocation4], 0  ;;  %s480_s9 = smov [#allocation2]   ;;  %s408_s13 = scalar_lea.hbm %s545_s0, 2048 }
   0x3   :  { %s15_s10 = sshll.u32 %s480_s9, 4  ;;  %p409_p0 = scmp.ne.s32.totalorder %s545_s0, %s408_s13  ;;  %s16_s10 = int_to_ptr.vmem [resolvable:$true] %s15_s10 }
   0x4   :  { %p412_p1 = scmp.lt.u32.totalorder %s408_s13, %s545_s0 }
   0x6   :  { %p414_p2 = pnand %p412_p1, %p409_p0 }
   0x8   :  { %417 = shalt.err (!%p414_p2)
}
   0x9   :  { %s418_s18 = scalar_lea.vmem %s16_s10, 2048  ;;  %p423_p4 = scmp.lt.s32.totalorder %s16_s10, %s16_s10 }
   0xa   :  { %p419_p3 = scmp.ne.s32.totalorder %s16_s10, %s418_s18  ;;  %p424_p5 = scmp.lt.s32.totalorder %s418_s18, %s418_s18 }
   0xc   :  { %p425_p6 = por %p424_p5, %p423_p4 }
   0xe   :  { %p426_p7 = pnand %p425_p6, %p419_p3 }
  0x10   :  { %429 = shalt.err (!%p426_p7)
}
  0x11   :  { %s481_s19 = smov 128   ;;  %s482_s20 = smov 8  }
  0x12   :  { %21 = dma.hbm_to_vmem [thread:$0]  %s545_s0, 2048, %s16_s10, [#allocation3], %s481_s19, %s481_s19, %s482_s20  }
  0x13   :  { %s483_s23 = smov [#allocation5]   ;;  %s430_s27 = scalar_lea.hbm %s546_s1, 2048 }
  0x14   :  { %s27_s24 = sshll.u32 %s483_s23, 4  ;;  %p431_p8 = scmp.ne.s32.totalorder %s546_s1, %s430_s27  ;;  %s28_s24 = int_to_ptr.vmem [resolvable:$true] %s27_s24 }
  0x15   :  { %p434_p9 = scmp.lt.u32.totalorder %s430_s27, %s546_s1 }
  0x17   :  { %p436_p10 = pnand %p434_p9, %p431_p8 }
  0x19   :  { %439 = shalt.err (!%p436_p10)
}
  0x1a   :  { %s440_s4 = scalar_lea.vmem %s28_s24, 2048  ;;  %p445_p12 = scmp.lt.s32.totalorder %s28_s24, %s28_s24 }
  0x1b   :  { %p441_p11 = scmp.ne.s32.totalorder %s28_s24, %s440_s4  ;;  %p446_p13 = scmp.lt.s32.totalorder %s440_s4, %s440_s4 }
  0x1d   :  { %p447_p0 = por %p446_p13, %p445_p12 }
  0x1f   :  { %p448_p1 = pnand %p447_p0, %p441_p11 }
  0x21   :  { %451 = shalt.err (!%p448_p1)
}
  0x22   :  { %33 = dma.hbm_to_vmem [thread:$0]  %s546_s1, 2048, %s28_s24, [#allocation6], %s481_s19, %s481_s19, %s482_s20  }
  0x23   :  { %474 = dma.done.wait [#allocation3], 2048  }
  0x24   :  { %475 = vsyncadd [#allocation3], 4294965248 }
  0x25   :  { %476 = dma.done.wait [#allocation6], 2048  }
  0x26   :  { %477 = vsyncadd [#allocation6], 4294965248  ;;  %v56_v0 = vld [vmem:[#allocation5] sm:$0xff]  ;;  %v57_v1 = vld [vmem:[#allocation5 + $0x8] sm:$0xff]  ;;  %s484_s1 = smov [#allocation7]  }
  0x27   :  { %v58_v2 = vld [vmem:[#allocation5 + $0x10] sm:$0xff]  ;;  %v355_v3 = vpack.c.bf16 %v57_v1, %v56_v0  ;;  %v59_v4 = vld [vmem:[#allocation5 + $0x18] sm:$0xff]  ;;  %v60_v6 = vld [vmem:[#allocation5 + $0x20] sm:$0xff]  ;;  %s254_s6 = sshll.u32 %s484_s1, 4  ;;  %s255_s6 = int_to_ptr.vmem [resolvable:$true] %s254_s6 }
  0x28   :  { %v359_v5 = vpack.c.bf16 %v59_v4, %v58_v2  ;;  %v61_v7 = vld [vmem:[#allocation5 + $0x28] sm:$0xff]  ;;  %v40_v9 = vld [vmem:[#allocation2] sm:$0xff]  ;;  %v62_v11 = vld [vmem:[#allocation5 + $0x30] sm:$0xff]  ;;  %s452_s7 = scalar_lea.vmem %s255_s6, 2048  ;;  %p457_p3 = scmp.lt.s32.totalorder %s255_s6, %s255_s6 }
  0x29   :  { %356 = vmatprep.subr.bf16.mxu0 %v355_v3  ;;  %387 = vmatprep.subr.bf16.mxu1 %v355_v3  ;;  %v363_v8 = vpack.c.bf16 %v61_v7, %v60_v6  ;;  %v48_v10 = vld [vmem:[#allocation2 + $0x40] sm:$0xff]  ;;  %v63_v12 = vld [vmem:[#allocation5 + $0x38] sm:$0xff]  ;;  %v65_v15 = vld [vmem:[#allocation5 + $0x48] sm:$0xff]  ;;  %p453_p2 = scmp.ne.s32.totalorder %s255_s6, %s452_s7  ;;  %p458_p4 = scmp.lt.s32.totalorder %s452_s7, %s452_s7 }
  0x2a   :  { %358 = vmatpush3.bf16.msra.mxu0 %v355_v3  ;;  %395 = vmatpush3.bf16.msra.mxu1 %v355_v3  ;;  %v367_v13 = vpack.c.bf16 %v63_v12, %v62_v11  ;;  %v64_v14 = vld [vmem:[#allocation5 + $0x40] sm:$0xff]  ;;  %v66_v17 = vld [vmem:[#allocation5 + $0x50] sm:$0xff]  ;;  %v67_v18 = vld [vmem:[#allocation5 + $0x58] sm:$0xff] }
  0x2b   :  { %360 = vmatprep.subr.bf16.mxu0 %v359_v5  ;;  %388 = vmatprep.subr.bf16.mxu1 %v359_v5  ;;  %v371_v16 = vpack.c.bf16 %v65_v15, %v64_v14  ;;  %v375_v19 = vpack.c.bf16 %v67_v18, %v66_v17  ;;  %v68_v20 = vld [vmem:[#allocation5 + $0x60] sm:$0xff]  ;;  %v69_v21 = vld [vmem:[#allocation5 + $0x68] sm:$0xff]  ;;  %v70_v23 = vld [vmem:[#allocation5 + $0x70] sm:$0xff]  ;;  %p459_p5 = por %p458_p4, %p457_p3 }
  0x2c   :  { %331 = vmatprep.mubr.f32.mxu0 %v40_v9  ;;  %343 = vmatprep.mubr.f32.mxu1 %v48_v10  ;;  %v379_v22 = vpack.c.bf16 %v69_v21, %v68_v20  ;;  %v71_v24 = vld [vmem:[#allocation5 + $0x78] sm:$0xff]  ;;  %v41_v26 = vld [vmem:[#allocation2 + $0x8] sm:$0xff]  ;;  %v42_v28 = vld [vmem:[#allocation2 + $0x10] sm:$0xff] }
  0x2d   :  { %v383_v25 = vpack.c.bf16 %v71_v24, %v70_v23  ;;  %v49_v27 = vld [vmem:[#allocation2 + $0x48] sm:$0xff]  ;;  %v50_v29 = vld [vmem:[#allocation2 + $0x50] sm:$0xff]  ;;  %v43_v30 = vld [vmem:[#allocation2 + $0x18] sm:$0xff]  ;;  %p460_p6 = pnand %p459_p5, %p453_p2 }
  0x2e   :  { %362 = vmatpush3.bf16.msra.mxu0 %v359_v5  ;;  %396 = vmatpush3.bf16.msra.mxu1 %v359_v5  ;;  %v51_v31 = vld [vmem:[#allocation2 + $0x58] sm:$0xff]  ;;  %v44_v32 = vld [vmem:[#allocation2 + $0x20] sm:$0xff]  ;;  %v45_v34 = vld [vmem:[#allocation2 + $0x28] sm:$0xff] }
  0x2f   :  { %364 = vmatprep.subr.bf16.mxu0 %v363_v8  ;;  %389 = vmatprep.subr.bf16.mxu1 %v363_v8  ;;  %v52_v33 = vld [vmem:[#allocation2 + $0x60] sm:$0xff]  ;;  %v53_v35 = vld [vmem:[#allocation2 + $0x68] sm:$0xff]  ;;  %v46_v36 = vld [vmem:[#allocation2 + $0x30] sm:$0xff] }
  0x30   :  { %v54_v37 = vld [vmem:[#allocation2 + $0x70] sm:$0xff]  ;;  %v47_v38 = vld [vmem:[#allocation2 + $0x38] sm:$0xff] }
  0x31   :  { %v55_v39 = vld [vmem:[#allocation2 + $0x78] sm:$0xff] }
  0x32   :  { %366 = vmatpush3.bf16.msra.mxu0 %v363_v8  ;;  %397 = vmatpush3.bf16.msra.mxu1 %v363_v8 }
  0x33   :  { %368 = vmatprep.subr.bf16.mxu0 %v367_v13  ;;  %390 = vmatprep.subr.bf16.mxu1 %v367_v13 }
  0x36   :  { %370 = vmatpush3.bf16.msra.mxu0 %v367_v13  ;;  %398 = vmatpush3.bf16.msra.mxu1 %v367_v13 }
  0x37   :  { %372 = vmatprep.subr.bf16.mxu0 %v371_v16  ;;  %391 = vmatprep.subr.bf16.mxu1 %v371_v16 }
  0x3a   :  { %374 = vmatpush3.bf16.msra.mxu0 %v371_v16  ;;  %399 = vmatpush3.bf16.msra.mxu1 %v371_v16 }
  0x3b   :  { %376 = vmatprep.subr.bf16.mxu0 %v375_v19  ;;  %392 = vmatprep.subr.bf16.mxu1 %v375_v19 }
  0x3e   :  { %378 = vmatpush3.bf16.msra.mxu0 %v375_v19  ;;  %400 = vmatpush3.bf16.msra.mxu1 %v375_v19 }
  0x3f   :  { %380 = vmatprep.subr.bf16.mxu0 %v379_v22  ;;  %393 = vmatprep.subr.bf16.mxu1 %v379_v22 }
  0x42   :  { %382 = vmatpush3.bf16.msra.mxu0 %v379_v22  ;;  %401 = vmatpush3.bf16.msra.mxu1 %v379_v22 }
  0x43   :  { %384 = vmatprep.subr.bf16.mxu0 %v383_v25  ;;  %394 = vmatprep.subr.bf16.mxu1 %v383_v25 }
  0x46   :  { %386 = vmatpush3.bf16.msra.mxu0 %v383_v25  ;;  %402 = vmatpush3.bf16.msra.mxu1 %v383_v25 }
  0x49   :  { %332 = vmatmul.mubr.f32.vlgmr.msra.gmra.mrb[0].mxu0 %v41_v26  ;;  %344 = vmatmul.mubr.f32.vlgmr.msra.gmra.mrb[0].mxu1 %v49_v27 }
  0x4a   :  { %334 = vmatprep.mubr.f32.mxu0 %v42_v28  ;;  %346 = vmatprep.mubr.f32.mxu1 %v50_v29 }
  0x4d   :  { %335 = vmatmul.mubr.f32.gmra.mrb[2].mxu0 %v43_v30  ;;  %347 = vmatmul.mubr.f32.gmra.mrb[2].mxu1 %v51_v31 }
  0x4e   :  { %337 = vmatprep.mubr.f32.mxu0 %v44_v32  ;;  %349 = vmatprep.mubr.f32.mxu1 %v52_v33 }
  0x51   :  { %338 = vmatmul.mubr.f32.gmra.mrb[4].mxu0 %v45_v34  ;;  %350 = vmatmul.mubr.f32.gmra.mrb[4].mxu1 %v53_v35 }
  0x52   :  { %340 = vmatprep.mubr.f32.mxu0 %v46_v36  ;;  %352 = vmatprep.mubr.f32.mxu1 %v54_v37 }
  0x55   :  { %341 = vmatmul.mubr.f32.gmra.mrb[6].mxu0 %v47_v38  ;;  %353 = vmatmul.mubr.f32.gmra.mrb[6].mxu1 %v55_v39 }
 0x11c   :  { %v333_v40 = vpop.f32.mrb[0].mxu0  ;;  %v345_v41 = vpop.f32.mrb[0].mxu1 }
 0x11d   :  { %v218_v42 = vmax.f32 %v333_v40, 0.0  ;;  %v226_v43 = vmax.f32 %v345_v41, 0.0  ;;  %v138_v44 = vpop.f32.mrb[1].mxu0  ;;  %v178_v45 = vpop.f32.mrb[1].mxu1 }
 0x11e   :  { %v217_v46 = vmax.f32 %v138_v44, 0.0  ;;  %v225_v47 = vmax.f32 %v178_v45, 0.0 }
 0x11f   :  { %234 = vst [vmem:[#allocation7 + $0x8] sm:$0xff] %v218_v42  ;;  %242 = vst [vmem:[#allocation7 + $0x48] sm:$0xff] %v226_v43 }
 0x120   :  { %233 = vst [vmem:[#allocation7] sm:$0xff] %v217_v46  ;;  %241 = vst [vmem:[#allocation7 + $0x40] sm:$0xff] %v225_v47  ;;  %v336_v48 = vpop.f32.mrb[2].mxu0  ;;  %v348_v49 = vpop.f32.mrb[2].mxu1 }
 0x121   :  { %v220_v50 = vmax.f32 %v336_v48, 0.0  ;;  %v228_v51 = vmax.f32 %v348_v49, 0.0  ;;  %v148_v52 = vpop.f32.mrb[3].mxu0  ;;  %v188_v53 = vpop.f32.mrb[3].mxu1 }
 0x122   :  { %v219_v54 = vmax.f32 %v148_v52, 0.0  ;;  %v227_v55 = vmax.f32 %v188_v53, 0.0 }
 0x123   :  { %236 = vst [vmem:[#allocation7 + $0x18] sm:$0xff] %v220_v50  ;;  %244 = vst [vmem:[#allocation7 + $0x58] sm:$0xff] %v228_v51 }
 0x124   :  { %235 = vst [vmem:[#allocation7 + $0x10] sm:$0xff] %v219_v54  ;;  %243 = vst [vmem:[#allocation7 + $0x50] sm:$0xff] %v227_v55  ;;  %v339_v56 = vpop.f32.mrb[4].mxu0  ;;  %v351_v57 = vpop.f32.mrb[4].mxu1 }
 0x125   :  { %v222_v58 = vmax.f32 %v339_v56, 0.0  ;;  %v230_v59 = vmax.f32 %v351_v57, 0.0  ;;  %v158_v60 = vpop.f32.mrb[5].mxu0  ;;  %v198_v61 = vpop.f32.mrb[5].mxu1 }
 0x126   :  { %v221_v62 = vmax.f32 %v158_v60, 0.0  ;;  %v229_v63 = vmax.f32 %v198_v61, 0.0 }
 0x127   :  { %238 = vst [vmem:[#allocation7 + $0x28] sm:$0xff] %v222_v58  ;;  %246 = vst [vmem:[#allocation7 + $0x68] sm:$0xff] %v230_v59 }
 0x128   :  { %237 = vst [vmem:[#allocation7 + $0x20] sm:$0xff] %v221_v62  ;;  %245 = vst [vmem:[#allocation7 + $0x60] sm:$0xff] %v229_v63  ;;  %v342_v0 = vpop.f32.mrb[6].mxu0  ;;  %v354_v1 = vpop.f32.mrb[6].mxu1 }
 0x129   :  { %v224_v2 = vmax.f32 %v342_v0, 0.0  ;;  %v232_v3 = vmax.f32 %v354_v1, 0.0  ;;  %v168_v4 = vpop.f32.mrb[7].mxu0  ;;  %v208_v5 = vpop.f32.mrb[7].mxu1 }
 0x12a   :  { %v223_v6 = vmax.f32 %v168_v4, 0.0  ;;  %v231_v7 = vmax.f32 %v208_v5, 0.0 }
 0x12b   :  { %240 = vst [vmem:[#allocation7 + $0x38] sm:$0xff] %v224_v2  ;;  %248 = vst [vmem:[#allocation7 + $0x78] sm:$0xff] %v232_v3 }
 0x12c   :  { %239 = vst [vmem:[#allocation7 + $0x30] sm:$0xff] %v223_v6  ;;  %247 = vst [vmem:[#allocation7 + $0x70] sm:$0xff] %v231_v7 }
 0x12d   :  { %463 = shalt.err (!%p460_p6)
}
 0x12e   :  { %s464_s10 = scalar_lea.hbm %s547_s2, 2048 }
 0x12f   :  { %p465_p7 = scmp.ne.s32.totalorder %s547_s2, %s464_s10  ;;  %p468_p8 = scmp.lt.u32.totalorder %s464_s10, %s547_s2 }
 0x131   :  { %p470_p9 = pnand %p468_p8, %p465_p7 }
 0x133   :  { %473 = shalt.err (!%p470_p9)
}
 0x134   :  { %260 = dma.vmem_to_hbm [thread:$0]  %s255_s6, 2048, %s547_s2, [#allocation4], %s481_s19, %s481_s19, %s482_s20  }
 0x135   :  { %478 = dma.done.wait [#allocation4], 2048  }
 0x136   :  { %479 = vsyncadd [#allocation4], 4294965248 }
 0x137   :  { %264 = vsyncpa [#allocation3], 1 }
 0x138   :  { %265 = vsyncpa [#allocation6], 1 }
 0x139   :  { %266 = vsyncpa [#allocation4], 1 }

</bundles_post_ra>
